<compile_context>
chip_gen: v6e
topology: v6e:2x2x1
jax: 0.10.0
libtpu: 0.0.40
codegen_flags: <defaults>
</compile_context>

<pallas_src>
import functools

import jax
import jax.numpy as jnp
from jax.experimental import pallas as pl
from jax.experimental.pallas import tpu as pltpu


# ---------------------------------------------------------------------------
# Pass 1: streaming global avg/max pool + fused channel MLP -> sigmoid gate.
# ---------------------------------------------------------------------------
def _pool_gate_kernel(x_ref, w1_ref, w2_ref, gate_ref, sum_acc, max_acc, *,
                      inv_hw):
    # x_ref: (C, THW) tile of one batch element (leading N dim is Squeezed).
    # w1_ref: (HID, C), w2_ref: (C, HID), gate_ref: (C, 1) f32 output.
    t = pl.program_id(1)

    @pl.when(t == 0)
    def _init():
        sum_acc[...] = jnp.zeros_like(sum_acc)
        max_acc[...] = jnp.full_like(max_acc, -jnp.inf)

    xb = x_ref[...].astype(jnp.float32)                            # (C, THW)
    sum_acc[...] += jnp.sum(xb, axis=1, keepdims=True)             # (C, 1)
    max_acc[...] = jnp.maximum(max_acc[...],
                               jnp.max(xb, axis=1, keepdims=True))

    @pl.when(t == pl.num_programs(1) - 1)
    def _finalize():
        # Fused avg/max branches: one fc1 matmul and one fc2 matmul on a
        # (C, 2) RHS instead of four trailing-dim-1 dots.
        pools = jnp.concatenate([sum_acc[...] * inv_hw, max_acc[...]],
                                axis=1)                            # (C, 2)
        h = jnp.maximum(
            jnp.dot(w1_ref[...].astype(jnp.float32), pools,
                    preferred_element_type=jnp.float32), 0.0)      # (HID, 2)
        o2 = jnp.dot(w2_ref[...].astype(jnp.float32), h,
                     preferred_element_type=jnp.float32)           # (C, 2)
        gate_ref[...] = jax.nn.sigmoid(o2[:, 0:1] + o2[:, 1:2])    # (C, 1)


# ---------------------------------------------------------------------------
# Pass 2: y = gate * x, tiled over HW (lane-dense stores, fully parallel grid).
# ---------------------------------------------------------------------------
def _scale_kernel(gate_ref, x_ref, o_ref):
    gate = gate_ref[...]                                           # (C, 1) f32
    o_ref[...] = (gate * x_ref[...].astype(jnp.float32)).astype(o_ref.dtype)


# ---------------------------------------------------------------------------
# Wrapper
# ---------------------------------------------------------------------------
def _pick_hw_tile(C, HW, itemsize, target_bytes=4 * 1024 * 1024):
    """Largest multiple-of-128 divisor of HW whose (C, tile) block stays under
    target_bytes.  Falls back to the full HW extent when HW % 128 != 0 (the
    last block dim must be a multiple of 128 or span the whole axis)."""
    if HW % 128 != 0:
        return HW
    max_lanes = max(128, target_bytes // max(C * itemsize, 1))
    best = 128
    for cand in range(128, HW + 1, 128):
        if HW % cand == 0 and cand <= max_lanes:
            best = cand
    return best


def _vmem_limit(nbytes):
    # Explicit scoped-VMEM request: our blocks + headroom, clamped so it also
    # fits v7x's 64 MiB physical VMEM (defaults: 16 MiB v5e, 32 MiB v6e/v7x).
    return int(min(64 * 1024 * 1024, max(32 * 1024 * 1024, nbytes)))


def channel_attention2(x_nchw, w1, w2):
    """x_nchw: (N, C, H, W); w1: (C//16, C) fc1 weight; w2: (C, C//16) fc2."""
    N, C, H, W = x_nchw.shape
    HID = w1.shape[0]
    HW = H * W
    x_flat = x_nchw.reshape(N, C, HW)
    itemsize = x_flat.dtype.itemsize

    thw = _pick_hw_tile(C, HW, itemsize)
    n_hw = HW // thw
    x_block_bytes = C * thw * itemsize
    w_bytes = int(w1.size * w1.dtype.itemsize + w2.size * w2.dtype.itemsize)
    gate_bytes = C * 4

    # ---- Pass 1: pooled sigmoid gate, shape (N, C, 1), f32. ---------------
    gate = pl.pallas_call(
        functools.partial(_pool_gate_kernel, inv_hw=1.0 / HW),
        out_shape=jax.ShapeDtypeStruct((N, C, 1), jnp.float32),
        grid_spec=pltpu.PrefetchScalarGridSpec(
            num_scalar_prefetch=0,
            grid=(N, n_hw),
            in_specs=[
                pl.BlockSpec((pl.Squeezed(), C, thw), lambda n, t: (n, 0, t)),
                pl.BlockSpec((HID, C), lambda n, t: (0, 0)),
                pl.BlockSpec((C, HID), lambda n, t: (0, 0)),
            ],
            out_specs=pl.BlockSpec((pl.Squeezed(), C, 1),
                                   lambda n, t: (n, 0, 0)),
            scratch_shapes=[pltpu.VMEM((C, 1), jnp.float32),
                            pltpu.VMEM((C, 1), jnp.float32)],
        ),
        compiler_params=pltpu.CompilerParams(
            dimension_semantics=("parallel", "arbitrary"),
            vmem_limit_bytes=_vmem_limit(
                2 * x_block_bytes + w_bytes + 8 * gate_bytes + (2 << 20)),
        ),
        cost_estimate=pl.CostEstimate(
            flops=int(2 * N * C * HW + 8 * N * C * HID),
            transcendentals=int(N * C),
            bytes_accessed=int(N * C * HW * itemsize + N * gate_bytes + w_bytes),
        ),
    )(x_flat, w1, w2)

    # ---- Pass 2: y = gate * x, lane-dense tiles over HW. ------------------
    out_flat = pl.pallas_call(
        _scale_kernel,
        out_shape=jax.ShapeDtypeStruct((N, C, HW), x_nchw.dtype),
        grid_spec=pltpu.PrefetchScalarGridSpec(
            num_scalar_prefetch=0,
            grid=(N, n_hw),
            in_specs=[
                pl.BlockSpec((pl.Squeezed(), C, 1), lambda n, t: (n, 0, 0)),
                pl.BlockSpec((pl.Squeezed(), C, thw), lambda n, t: (n, 0, t)),
            ],
            out_specs=pl.BlockSpec((pl.Squeezed(), C, thw),
                                   lambda n, t: (n, 0, t)),
        ),
        compiler_params=pltpu.CompilerParams(
            dimension_semantics=("parallel", "parallel"),
            vmem_limit_bytes=_vmem_limit(
                4 * x_block_bytes + 2 * gate_bytes + (2 << 20)),
        ),
        cost_estimate=pl.CostEstimate(
            flops=int(N * C * HW),
            transcendentals=0,
            bytes_accessed=int(2 * N * C * HW * itemsize + N * gate_bytes),
        ),
    )(gate, x_flat)

    return out_flat.reshape(N, C, H, W)


def reference(x_nchw, w1, w2):
    # Pure-JAX reference for correctness check.
    avg = jnp.mean(x_nchw, axis=(2, 3))                      # (N, C)
    mx = jnp.max(x_nchw, axis=(2, 3))                        # (N, C)

    def mlp(p):                                              # p: (N, C)
        return jnp.maximum(p @ w1.T, 0.0) @ w2.T             # (N, C)

    gate = jax.nn.sigmoid(mlp(avg) + mlp(mx))                # (N, C)
    return gate[:, :, None, None] * x_nchw


if __name__ == "__main__":
    key = jax.random.PRNGKey(0)
    k_x, k_w1, k_w2, k_x2, k_w3, k_w4 = jax.random.split(key, 6)

    # Case 1: vreg-aligned shapes (C % 8 == 0, HW % 128 == 0).
    N, C, H, W = 2, 32, 16, 16          # hidden = C // 16 = 2
    HID = C // 16
    x = jax.random.normal(k_x, (N, C, H, W), dtype=jnp.float32)
    w1 = jax.random.normal(k_w1, (HID, C), dtype=jnp.float32) * 0.1
    w2 = jax.random.normal(k_w2, (C, HID), dtype=jnp.float32) * 0.1
    y = jax.block_until_ready(channel_attention2(x, w1, w2))
    assert y.shape == (N, C, H, W)
    assert jnp.allclose(y, reference(x, w1, w2), atol=1e-5, rtol=1e-5), \
        "mismatch vs reference (aligned case)"

    # Case 2: ragged shapes (C % 8 != 0, HW % 128 != 0) — masked-lane paths.
    N2, C2, H2, W2 = 1, 36, 7, 7        # hidden = 36 // 16 = 2, HW = 49
    HID2 = C2 // 16
    x2 = jax.random.normal(k_x2, (N2, C2, H2, W2), dtype=jnp.float32)
    w3 = jax.random.normal(k_w3, (HID2, C2), dtype=jnp.float32) * 0.1
    w4 = jax.random.normal(k_w4, (C2, HID2), dtype=jnp.float32) * 0.1
    y2 = jax.block_until_ready(channel_attention2(x2, w3, w4))
    assert y2.shape == (N2, C2, H2, W2)
    assert jnp.allclose(y2, reference(x2, w3, w4), atol=1e-5, rtol=1e-5), \
        "mismatch vs reference (ragged case)"

    print("KERNEL_OK")
</pallas_src>

<mosaic_0001>
module attributes {stable_mosaic.version = 11 : i64} {
  func.func @_pool_gate_kernel(%arg0: i32, %arg1: i32, %arg2: memref<1x32x256xf32, #tpu.memory_space<vmem>>, %arg3: memref<2x32xf32, #tpu.memory_space<vmem>>, %arg4: memref<32x2xf32, #tpu.memory_space<vmem>>, %arg5: memref<1x32x1xf32, #tpu.memory_space<vmem>>, %arg6: memref<32x1xf32, #tpu.memory_space<vmem>>, %arg7: memref<32x1xf32, #tpu.memory_space<vmem>>) attributes {dimension_semantics = [#tpu.dimension_semantics<parallel>, #tpu.dimension_semantics<arbitrary>], iteration_bounds = array<i64: 2, 1>, scalar_prefetch = 0 : i64, scratch_operands = 2 : i64, tpu.core_type = #tpu.core_type<tc>, window_params = [{transform_indices = @transform_0, window_bounds = array<i64: 1, 32, 256>}, {pipeline_mode = #tpu.pipeline_mode<synchronous>, transform_indices = @transform_1, window_bounds = array<i64: 2, 32>}, {pipeline_mode = #tpu.pipeline_mode<synchronous>, transform_indices = @transform_2, window_bounds = array<i64: 32, 2>}, {transform_indices = @transform_3, window_bounds = array<i64: 1, 32, 1>}]} {
    %c0_i32 = arith.constant 0 : i32
    %0 = arith.cmpi eq, %arg1, %c0_i32 : i32
    %1 = arith.extui %0 : i1 to i32
    %c0_i32_0 = arith.constant 0 : i32
    %2 = arith.cmpi ne, %1, %c0_i32_0 : i32
    scf.if %2 {
      %cst_14 = arith.constant 0.000000e+00 : f32
      %18 = vector.broadcast %cst_14 : f32 to vector<32x1xf32>
      %c0_15 = arith.constant 0 : index
      %c0_16 = arith.constant 0 : index
      %19 = vector.load %arg6[%c0_15, %c0_16] : memref<32x1xf32, #tpu.memory_space<vmem>>, vector<32x1xf32>
      tpu.vector_store %arg6[%c0_15, %c0_16], %18 {strides = array<i32>} : memref<32x1xf32, #tpu.memory_space<vmem>>, vector<32x1xf32>,
      %cst_17 = arith.constant 0xFF800000 : f32
      %20 = vector.broadcast %cst_17 : f32 to vector<32x1xf32>
      %c0_18 = arith.constant 0 : index
      %c0_19 = arith.constant 0 : index
      %21 = vector.load %arg7[%c0_18, %c0_19] : memref<32x1xf32, #tpu.memory_space<vmem>>, vector<32x1xf32>
      tpu.vector_store %arg7[%c0_18, %c0_19], %20 {strides = array<i32>} : memref<32x1xf32, #tpu.memory_space<vmem>>, vector<32x1xf32>,
    } else {
    }
    %c0 = arith.constant 0 : index
    %c0_1 = arith.constant 0 : index
    %c0_2 = arith.constant 0 : index
    %3 = vector.load %arg2[%c0, %c0_1, %c0_2] : memref<1x32x256xf32, #tpu.memory_space<vmem>>, vector<1x32x256xf32>
    %4 = vector.shape_cast %3 : vector<1x32x256xf32> to vector<32x256xf32>
    %c0_3 = arith.constant 0 : index
    %c0_4 = arith.constant 0 : index
    %5 = vector.load %arg6[%c0_3, %c0_4] : memref<32x1xf32, #tpu.memory_space<vmem>>, vector<32x1xf32>
    %cst = arith.constant dense<0.000000e+00> : vector<32xf32>
    %6 = vector.multi_reduction <add>, %4, %cst [1] : vector<32x256xf32> to vector<32xf32>
    %7 = vector.shape_cast %6 : vector<32xf32> to vector<32x1xf32>
    %8 = arith.addf %5, %7 : vector<32x1xf32>
    %c0_5 = arith.constant 0 : index
    %c0_6 = arith.constant 0 : index
    %9 = vector.load %arg6[%c0_5, %c0_6] : memref<32x1xf32, #tpu.memory_space<vmem>>, vector<32x1xf32>
    tpu.vector_store %arg6[%c0_5, %c0_6], %8 {strides = array<i32>} : memref<32x1xf32, #tpu.memory_space<vmem>>, vector<32x1xf32>,
    %c0_7 = arith.constant 0 : index
    %c0_8 = arith.constant 0 : index
    %10 = vector.load %arg7[%c0_7, %c0_8] : memref<32x1xf32, #tpu.memory_space<vmem>>, vector<32x1xf32>
    %cst_9 = arith.constant dense<0xFF800000> : vector<32xf32>
    %11 = vector.multi_reduction <maximumf>, %4, %cst_9 [1] : vector<32x256xf32> to vector<32xf32>
    %12 = vector.shape_cast %11 : vector<32xf32> to vector<32x1xf32>
    %13 = arith.maximumf %10, %12 : vector<32x1xf32>
    %c0_10 = arith.constant 0 : index
    %c0_11 = arith.constant 0 : index
    %14 = vector.load %arg7[%c0_10, %c0_11] : memref<32x1xf32, #tpu.memory_space<vmem>>, vector<32x1xf32>
    tpu.vector_store %arg7[%c0_10, %c0_11], %13 {strides = array<i32>} : memref<32x1xf32, #tpu.memory_space<vmem>>, vector<32x1xf32>,
    %c0_i32_12 = arith.constant 0 : i32
    %15 = arith.cmpi eq, %arg1, %c0_i32_12 : i32
    %16 = arith.extui %15 : i1 to i32
    %c0_i32_13 = arith.constant 0 : i32
    %17 = arith.cmpi ne, %16, %c0_i32_13 : i32
    scf.if %17 {
      %c0_14 = arith.constant 0 : index
      %c0_15 = arith.constant 0 : index
      %18 = vector.load %arg6[%c0_14, %c0_15] : memref<32x1xf32, #tpu.memory_space<vmem>>, vector<32x1xf32>
      %cst_16 = arith.constant 3.906250e-03 : f32
      %19 = vector.broadcast %cst_16 : f32 to vector<32x1xf32>
      %20 = arith.mulf %18, %19 : vector<32x1xf32>
      %c0_17 = arith.constant 0 : index
      %c0_18 = arith.constant 0 : index
      %21 = vector.load %arg7[%c0_17, %c0_18] : memref<32x1xf32, #tpu.memory_space<vmem>>, vector<32x1xf32>
      %22 = tpu.concatenate %20, %21 in 1 : vector<32x1xf32>, vector<32x1xf32> -> vector<32x2xf32>
      %c0_19 = arith.constant 0 : index
      %c0_20 = arith.constant 0 : index
      %23 = vector.load %arg3[%c0_19, %c0_20] : memref<2x32xf32, #tpu.memory_space<vmem>>, vector<2x32xf32>
      %cst_21 = arith.constant dense<0.000000e+00> : vector<2x2xf32>
      %24 = tpu.matmul %23, %22, %cst_21 {dimension_numbers = #tpu.dot_dimension_numbers<[1], [0], [0], [1], [0, 0, 1, 1], [], []>} : vector<2x32xf32>, vector<32x2xf32>, vector<2x2xf32> -> vector<2x2xf32>
      %cst_22 = arith.constant 0.000000e+00 : f32
      %25 = vector.broadcast %cst_22 : f32 to vector<2x2xf32>
      %26 = arith.maximumf %24, %25 : vector<2x2xf32>
      %c0_23 = arith.constant 0 : index
      %c0_24 = arith.constant 0 : index
      %27 = vector.load %arg4[%c0_23, %c0_24] : memref<32x2xf32, #tpu.memory_space<vmem>>, vector<32x2xf32>
      %cst_25 = arith.constant dense<0.000000e+00> : vector<32x2xf32>
      %28 = tpu.matmul %27, %26, %cst_25 {dimension_numbers = #tpu.dot_dimension_numbers<[1], [0], [0], [1], [0, 0, 1, 1], [], []>} : vector<32x2xf32>, vector<2x2xf32>, vector<32x2xf32> -> vector<32x2xf32>
      %29 = vector.extract_strided_slice %28 {offsets = [0, 0], sizes = [32, 1], strides = [1, 1]} : vector<32x2xf32> to vector<32x1xf32>
      %30 = vector.extract_strided_slice %28 {offsets = [0, 1], sizes = [32, 1], strides = [1, 1]} : vector<32x2xf32> to vector<32x1xf32>
      %31 = arith.addf %29, %30 : vector<32x1xf32>
      %32 = arith.negf %31 : vector<32x1xf32>
      %33 = math.exp %32 : vector<32x1xf32>
      %cst_26 = arith.constant 1.000000e+00 : f32
      %34 = vector.broadcast %cst_26 : f32 to vector<32x1xf32>
      %35 = arith.addf %34, %33 : vector<32x1xf32>
      %36 = arith.divf %34, %35 : vector<32x1xf32>
      %c0_27 = arith.constant 0 : index
      %c0_28 = arith.constant 0 : index
      %c0_29 = arith.constant 0 : index
      %37 = vector.load %arg5[%c0_27, %c0_28, %c0_29] : memref<1x32x1xf32, #tpu.memory_space<vmem>>, vector<1x32x1xf32>
      %38 = vector.shape_cast %37 : vector<1x32x1xf32> to vector<32x1xf32>
      %39 = vector.shape_cast %36 : vector<32x1xf32> to vector<1x32x1xf32>
      tpu.vector_store %arg5[%c0_27, %c0_28, %c0_29], %39 {strides = array<i32>} : memref<1x32x1xf32, #tpu.memory_space<vmem>>, vector<1x32x1xf32>,
    } else {
    }
    return
  }
  func.func @transform_0(%arg0: i32, %arg1: i32) -> (i32, i32, i32) {
    %c0_i32 = arith.constant 0 : i32
    %c0_i32_0 = arith.constant 0 : i32
    return %arg0, %c0_i32, %arg1 : i32, i32, i32
  }
  func.func @transform_1(%arg0: i32, %arg1: i32) -> (i32, i32) {
    %c0_i32 = arith.constant 0 : i32
    %c0_i32_0 = arith.constant 0 : i32
    %c0_i32_1 = arith.constant 0 : i32
    return %c0_i32, %c0_i32_0 : i32, i32
  }
  func.func @transform_2(%arg0: i32, %arg1: i32) -> (i32, i32) {
    %c0_i32 = arith.constant 0 : i32
    %c0_i32_0 = arith.constant 0 : i32
    %c0_i32_1 = arith.constant 0 : i32
    return %c0_i32, %c0_i32_0 : i32, i32
  }
  func.func @transform_3(%arg0: i32, %arg1: i32) -> (i32, i32, i32) {
    %c0_i32 = arith.constant 0 : i32
    %c0_i32_0 = arith.constant 0 : i32
    %c0_i32_1 = arith.constant 0 : i32
    return %arg0, %c0_i32, %c0_i32_0 : i32, i32, i32
  }
}

</mosaic_0001>

<bundles_post_ra>
// kernel: tpu_custom_call.1
= control target key start
LH: loop header
LB: loop body
LE: loop exit
PB: predicated region body
PF: predicated region fallthrough
CT: control target
= control target key end

     0   :  { %8 = vsyncpa [#allocation5], 0  ;;  %s1005_s0 = inlined_call_operand.hbm [shape: f32[2,32,256], index: 0, kind: input, shape index: {}]   ;;  %s1006_s1 = inlined_call_operand.vmem [shape: f32[2,32], index: 1, kind: input, shape index: {}]   ;;  %s1007_s2 = inlined_call_operand.vmem [shape: f32[32,2], index: 2, kind: input, shape index: {}]   ;;  %s1008_s3 = inlined_call_operand.vmem [shape: f32[2,32,1], index: 3, kind: output, shape index: {}]  }
   0x1   :  { %10 = vsyncpa [#allocation5 + $0x1], 0  ;;  %s861_s12 = smov 0   ;;  %s863_s13 = smov 0  }
   0x2   :  { %s865_s14 = smov 0   ;;  %s867_s15 = smov 0  }
   0x3   :  { %s869_s16 = smov 0   ;;  %s871_s17 = smov 0  }
   0x4 LB: > { %s621_s18 = sadd.s32 4294967295, %s831_s17   ;;  %s28_s19 = sadd.s32 1, %s827_s16  ;;  %s831_s17 = sphi %s871_s17, %s16_s17   ;;  %s827_s16 = sphi %s869_s16, %s1016_s16   ;;  %s823_s15 = sphi %s867_s15, %s1015_s15   ;;  %s819_s14 = sphi %s865_s14, %s1014_s14   ;;  %s815_s13 = sphi %s863_s13, %s1013_s13   ;;  %s811_s12 = sphi %s861_s12, %s1012_s12  }
   0x5   : > { %p30_p0 = scmp.ge.s32.totalorder %s28_s19, 2  ;;  %s37_s20 = sadd.s32 1, %s819_s14 }
   0x6   : > { %p44_p1 = scmp.ne.s32.totalorder %s819_s14, %s815_s13  ;;  %p45_p2 = scmp.eq.s32.totalorder %s831_s17, 0 }
   0x7   : > { %s1018_s19 = smov (%p30_p0, %s28_s19), 0  ;;  %p50_p4 = scmp.ne.s32.totalorder %s815_s13, %s811_s12 }
   0x8   : > { %p897_p3 = por %p45_p2, %p44_p1  ;;  %s32_s22 = ssub.s32 %s827_s16, %s1018_s19 }
   0x9   : > { %p51_p5 = scmp.eq.s32.totalorder %s621_s18, 0  ;;  %p35_p6 = scmp.eq.s32.totalorder %s32_s22, 0 }
   0xa   : > { %p681_p8 = scmp.lt.s32.totalorder %s831_s17, 2  ;;  %s148_s25 = sand.u32 1, %s819_s14  }
   0xb   : > { %p904_p7 = por %p51_p5, %p50_p4  ;;  %s644_s26 = sshll.u32 %s827_s16, 10 }
   0xc   : > { %s910_s24 = scalar_select %p35_p6, %s819_s14, %s37_s20  }
   0xd   : > { %s625_s27 = sshll.u32 %s148_s25, 6  ;;  %s160_s30 = scalar_lea.hbm %s1005_s0, %s644_s26 }
   0xe   : > { %s152_s4 = scalar_lea.vmem [#allocation4], %s625_s27  ;;  %p919_p9 = pnand %p681_p8, %p897_p3 }
   0xf   : > { %s161_s5 = sshll.u32 %s152_s4, 4  ;;  %s149_s7 = scalar_lea.sflag [#allocation5], %s148_s25  ;;  %s162_s5 = int_to_ptr.vmem [resolvable:$true] %s161_s5 }
  0x10   : > { %p755_p10 = pneg %p919_p9  ;;  %s766_s8 = scalar_lea.vmem %s162_s5, 1024 }
  0x11   : > { %p767_p11 = scmp.ne.s32.totalorder %s162_s5, %s766_s8  ;;  %s833_s9 = smov [#allocation4]  }
  0x12   : > { %s771_s10 = sshll.u32 %s833_s9, 4  ;;  %s772_s10 = int_to_ptr.vmem [resolvable:$false] %s771_s10 }
  0x13   : > { %p769_p12 = pnand %p767_p11, %p755_p10  ;;  %s773_s11 = scalar_lea.vmem %s772_s10, 2048 }
  0x14   : > { %p774_p0 = scmp.lt.s32.totalorder %s162_s5, %s772_s10  ;;  %p775_p1 = scmp.lt.s32.totalorder %s773_s11, %s766_s8 }
  0x15   : > { %p770_p13 = pneg %p769_p12 }
  0x16   : > { %p776_p2 = por %p775_p1, %p774_p0 }
  0x18   : > { %p777_p3 = pnand %p776_p2, %p770_p13 }
  0x1a   : > { %780 = shalt.err (!%p777_p3)
}
  0x1b   : > { %s834_s12 = smov 256   ;;  %s835_s18 = smov 16  }
  0x1c   : > { %680 = dma.hbm_to_vmem [thread:$0]  (!%p919_p9), %s160_s30, 1024, %s162_s5, %s149_s7, %s834_s12, %s834_s12, %s835_s18  }
  0x1d   : > { %p628_p4 = scmp.ge.s32.totalorder %s831_s17, 1  ;;  %p169_p5 = scmp.lt.s32.totalorder %s831_s17, 3 }
  0x1f   : > { %p170_p6 = pnand %p628_p4, %p169_p5 }
  0x20   : > { %s175_s20 = sand.u32 (!%p170_p6), 1, %s815_s13  }
  0x21   : > { %173 = sbr.rel (%p170_p6) target bundleno = 865 (0x361), region = 32  ;;  %s629_s21 = sshll.u32 (!%p170_p6), %s175_s20, 6 }
  0x22   : > { %s176_s22 = scalar_lea.sflag (!%p170_p6), [#allocation5], %s175_s20  ;;  %s179_s25 = scalar_lea.vmem (!%p170_p6), [#allocation4], %s629_s21 }
  0x26   : > { %806 = dma.done.wait (%p904_p7), %s176_s22, 1024  }
  0x27   : > { %808 = vsyncadd (%p904_p7), %s176_s22, 4294966272  ;;  %vm212_vm0 = vcmask 7168   ;;  %v836_v0 = vmov -inf   ;;  %v227_v1 = vld [vmem:[%s179_s25 + $0x30] sm:$0xff]  ;;  %v228_v2 = vld [vmem:[%s179_s25 + $0x38] sm:$0xff]  ;;  %v837_v17 = vmov 0.0  }
  0x28   : > { %220 = vst.msk [vmem:[#allocation3 + $0x18] sm:$0xff] %vm212_vm0, %v836_v0  ;;  %217 = vst.msk [vmem:[#allocation3] sm:$0xff] %vm212_vm0, %v836_v0  ;;  %v225_v3 = vld [vmem:[%s179_s25 + $0x20] sm:$0xff]  ;;  %v267_v4 = vmax.f32 %v227_v1, %v228_v2  ;;  %v226_v5 = vld [vmem:[%s179_s25 + $0x28] sm:$0xff]  ;;  %v242_v13 = vadd.f32 %v228_v2, %v227_v1  ;;  %656 = vmatprep.subr.mxu0 %v837_v17  ;;  %s838_s23 = smov 1   ;;  %vm839_vm1 = vmmov 0  }
  0x29   : > { %218 = vst.msk [vmem:[#allocation3 + $0x8] sm:$0xff] %vm212_vm0, %v836_v0  ;;  %219 = vst.msk [vmem:[#allocation3 + $0x10] sm:$0xff] %vm212_vm0, %v836_v0  ;;  %v223_v6 = vld [vmem:[%s179_s25 + $0x10] sm:$0xff]  ;;  %v224_v7 = vld [vmem:[%s179_s25 + $0x18] sm:$0xff]  ;;  %v264_v11 = vmax.f32 %v225_v3, %v226_v5  ;;  %v239_v14 = vadd.f32 %v226_v5, %v225_v3  ;;  %664 = vmatprep.mubr.msk.f32.mxu0 %vm839_vm1, %v837_v17  ;;  %vm314_vm2 = vcmask 261120   ;;  %vm393_vm3 = vcmask 15360  }
  0x2a   : > { %v261_v8 = vmax.f32 %v223_v6, %v224_v7  ;;  %v221_v9 = vld [vmem:[%s179_s25] sm:$0xff]  ;;  %v222_v10 = vld [vmem:[%s179_s25 + $0x8] sm:$0xff]  ;;  %268 = vmax.xlane.f32.xlu0 %v267_v4  ;;  %v236_v15 = vadd.f32 %v224_v7, %v223_v6  ;;  %216 = vst.msk [vmem:[#allocation2 + $0x18] sm:$0xff] %vm212_vm0, %v837_v17  ;;  %213 = vst.msk [vmem:[#allocation2] sm:$0xff] %vm212_vm0, %v837_v17  ;;  %vm406_vm4 = vcmask 1041408   ;;  %s840_s9 = smov 127  }
  0x2b   : > { %v258_v12 = vmax.f32 %v221_v9, %v222_v10  ;;  %v233_v16 = vadd.f32 %v222_v10, %v221_v9  ;;  %214 = vst.msk [vmem:[#allocation2 + $0x8] sm:$0xff] %vm212_vm0, %v837_v17  ;;  %215 = vst.msk [vmem:[#allocation2 + $0x10] sm:$0xff] %vm212_vm0, %v837_v17  ;;  %v313_v61 = vld [vmem:[%s1006_s1] sm:$0x3]  ;;  %v390_v3 = vld [vmem:[%s1007_s2 + $0x8] sm:$0xff]  ;;  %p203_p7 = scmp.lt.s32.totalorder %s823_s15, 1 }
  0x2c   : > { %262 = vmax.xlane.f32.xlu1 %v261_v8  ;;  %v389_v63 = vld [vmem:[%s1007_s2] sm:$0xff]  ;;  %v391_v4 = vld [vmem:[%s1007_s2 + $0x10] sm:$0xff]  ;;  %v392_v5 = vld [vmem:[%s1007_s2 + $0x18] sm:$0xff] }
  0x2d   : > { %669 = vmatprep.mubr.msk.f32.mxu1 %vm393_vm3, %v389_v63  ;;  %s1020_s15 = smov (!%p203_p7, %s823_s15), 1 }
  0x2e   : > { %265 = vmax.xlane.f32.xlu0 %v264_v11  ;;  %s645_s10 = sshll.u32 %s1020_s15, 5 }
  0x2f   : > { %v257_v18 = vld [vmem:[#allocation3 + $0x18] sm:$0xff]  ;;  %v254_v25 = vld [vmem:[#allocation3] sm:$0xff]  ;;  %s207_s18 = scalar_lea.vmem %s1008_s3, %s645_s10 }
  0x30   : > { %259 = vmax.xlane.f32.xlu1 %v258_v12  ;;  %v255_v19 = vld [vmem:[#allocation3 + $0x8] sm:$0xff]  ;;  %v256_v23 = vld [vmem:[#allocation3 + $0x10] sm:$0xff] }
  0x31   : > { %v232_v30 = vld [vmem:[#allocation2 + $0x18] sm:$0xff]  ;;  %v229_v38 = vld [vmem:[#allocation2] sm:$0xff] }
  0x32   : > { %243 = vadd.xlane.f32.xlu0 %v242_v13  ;;  %v231_v31 = vld [vmem:[#allocation2 + $0x10] sm:$0xff]  ;;  %v230_v37 = vld [vmem:[#allocation2 + $0x8] sm:$0xff] }
  0x34   : > { %240 = vadd.xlane.f32.xlu1 %v239_v14 }
  0x36   : > { %237 = vadd.xlane.f32.xlu0 %v236_v15 }
  0x38   : > { %234 = vadd.xlane.f32.xlu1 %v233_v16 }
  0xb3   : > { %v269_v20 = vpop.xlane.xlu0 %268 }
  0xb4   : > { %v273_v21 = vmax.f32 %v257_v18, %v269_v20 }
  0xb5   : > { %v263_v22 = vpop.xlane.xlu1 %262 }
  0xb6   : > { %v271_v24 = vmax.f32 %v255_v19, %v263_v22  ;;  %277 = vst.msk [vmem:[#allocation3 + $0x18] sm:$0xff] %vm212_vm0, %v273_v21 }
  0xb7   : > { %v266_v26 = vpop.xlane.xlu0 %265 }
  0xb8   : > { %275 = vst.msk [vmem:[#allocation3 + $0x8] sm:$0xff] %vm212_vm0, %v271_v24  ;;  %v272_v27 = vmax.f32 %v256_v23, %v266_v26 }
  0xb9   : > { %v260_v28 = vpop.xlane.xlu1 %259 }
  0xba   : > { %v270_v29 = vmax.f32 %v254_v25, %v260_v28  ;;  %276 = vst.msk [vmem:[#allocation3 + $0x10] sm:$0xff] %vm212_vm0, %v272_v27 }
  0xbb   : > { %v244_v32 = vpop.xlane.xlu0 %243 }
  0xbc   : > { %274 = vst.msk [vmem:[#allocation3] sm:$0xff] %vm212_vm0, %v270_v29  ;;  %v248_v33 = vadd.f32 %v244_v32, %v232_v30 }
  0xbd   : > { %v241_v34 = vpop.xlane.xlu1 %240  ;;  %v292_v35 = vld [vmem:[#allocation3 + $0x18] sm:$0xff] }
  0xbe   : > { %v247_v36 = vadd.f32 %v241_v34, %v231_v31  ;;  %303 = vrot.lane.b32.xlu0 %v292_v35, %s838_s23  ;;  %253 = vst.msk [vmem:[#allocation2 + $0x18] sm:$0xff] %vm212_vm0, %v248_v33 }
  0xbf   : > { %v238_v39 = vpop.xlane.xlu0 %237  ;;  %v290_v44 = vld [vmem:[#allocation3 + $0x8] sm:$0xff] }
  0xc0   : > { %252 = vst.msk [vmem:[#allocation2 + $0x10] sm:$0xff] %vm212_vm0, %v247_v36  ;;  %v246_v40 = vadd.f32 %v238_v39, %v230_v37 }
  0xc1   : > { %v235_v41 = vpop.xlane.xlu1 %234  ;;  %v291_v42 = vld [vmem:[#allocation3 + $0x10] sm:$0xff] }
  0xc2   : > { %v245_v43 = vadd.f32 %v235_v41, %v229_v38  ;;  %301 = vrot.lane.b32.xlu1 %v291_v42, %s838_s23  ;;  %251 = vst.msk [vmem:[#allocation2 + $0x8] sm:$0xff] %vm212_vm0, %v246_v40 }
  0xc3   : > { %v289_v45 = vld [vmem:[#allocation3] sm:$0xff] }
  0xc4   : > { %250 = vst.msk [vmem:[#allocation2] sm:$0xff] %vm212_vm0, %v245_v43 }
  0xc5   : > { %v284_v46 = vld [vmem:[#allocation2 + $0x18] sm:$0xff] }
  0xc6   : > { %299 = vrot.lane.b32.xlu1 %v290_v44, %s838_s23  ;;  %v288_v47 = vmul.f32 0.00390625, %v284_v46 }
  0xc7   : > { %v283_v48 = vld [vmem:[#allocation2 + $0x10] sm:$0xff] }
  0xc8   : > { %v287_v51 = vmul.f32 0.00390625, %v283_v48 }
  0xc9   : > { %v282_v52 = vld [vmem:[#allocation2 + $0x8] sm:$0xff] }
  0xca   : > { %297 = vrot.lane.b32.xlu1 %v289_v45, %s838_s23  ;;  %v286_v55 = vmul.f32 0.00390625, %v282_v52 }
  0xcb   : > { %v281_v56 = vld [vmem:[#allocation2] sm:$0xff] }
  0xcc   : > { %v285_v59 = vmul.f32 0.00390625, %v281_v56 }
 0x130   : > { %v304_v49 = vpop.permute.xlu0 %303 }
 0x131   : > { %v312_v50 = vsel %vm212_vm0, %v288_v47, %v304_v49 }
 0x132   : > { %657 = vmatpush3.msra.mxu0 %v312_v50 }
 0x133   : > { %658 = vmatprep.subr.mxu0 %v837_v17 }
 0x134   : > { %v302_v53 = vpop.permute.xlu1 %301 }
 0x135   : > { %v311_v54 = vsel %vm212_vm0, %v287_v51, %v302_v53 }
 0x136   : > { %659 = vmatpush3.msra.mxu0 %v311_v54 }
 0x137   : > { %660 = vmatprep.subr.mxu0 %v837_v17 }
 0x138   : > { %v300_v57 = vpop.permute.xlu1 %299 }
 0x139   : > { %v310_v58 = vsel %vm212_vm0, %v286_v55, %v300_v57 }
 0x13a   : > { %661 = vmatpush3.msra.mxu0 %v310_v58 }
 0x13b   : > { %662 = vmatprep.subr.mxu0 %v837_v17 }
 0x13c   : > { %v298_v60 = vpop.permute.xlu1 %297 }
 0x13d   : > { %v309_v62 = vsel %vm212_vm0, %v285_v59, %v298_v60 }
 0x13e   : > { %663 = vmatpush3.msra.mxu0 %v309_v62 }
 0x13f   : > { %665 = vmatmul.mubr.msk.f32.vlgmr.msra.gmra.mxu0 %vm314_vm2, %v313_v61 }
 0x1ff   : > { %v384_v0 = vpop.f32.mrf.mxu0 }
 0x200   : > { %v388_v1 = vmax.f32 %v384_v0, 0.0 }
 0x201   : > { %v666_v2 = vpop.f32.mrf.mxu0 }
 0x202   : > { %667 = vmatprep.subr.msk.mxu1 %vm406_vm4, %v388_v1 }
 0x203   : > { %668 = vmatpush3.msk.msra.mxu1 %vm406_vm4, %v388_v1 }
 0x204   : > { %670 = vmatmul.mubr.msk.f32.vlgmr.msra.gmra.mxu1 %vm393_vm3, %v390_v3 }
 0x205   : > { %672 = vmatprep.mubr.msk.f32.mxu1 %vm393_vm3, %v391_v4 }
 0x208   : > { %673 = vmatmul.mubr.msk.f32.gmra.mxu1 %vm393_vm3, %v392_v5 }
 0x2c4   : > { %v671_v6 = vpop.f32.mrf.mxu1 }
 0x2c5   : > { %501 = vrot.lane.b32.xlu1 %v671_v6, %s840_s9 }
 0x2c6   : > { %v476_v7 = vpop.f32.mrf.mxu1 }
 0x2c7   : > { %499 = vrot.lane.b32.xlu0 %v476_v7, %s840_s9 }
 0x2c8   : > { %v674_v8 = vpop.f32.mrf.mxu1 }
 0x2c9   : > { %505 = vrot.lane.b32.xlu1 %v674_v8, %s840_s9 }
 0x2ca   : > { %v486_v9 = vpop.f32.mrf.mxu1 }
 0x2cb   : > { %503 = vrot.lane.b32.xlu0 %v486_v9, %s840_s9 }
 0x337   : > { %v502_v10 = vpop.permute.xlu1 %501 }
 0x338   : > { %v512_v11 = vadd.f32 %v671_v6, %v502_v10 }
 0x339   : > { %v500_v12 = vpop.permute.xlu0 %499 }
 0x33a   : > { %v639_v13 = vmul.f32 -1.442695, %v512_v11  ;;  %v511_v14 = vadd.f32 %v500_v12, %v476_v7 }
 0x33b   : > { %v506_v15 = vpop.permute.xlu1 %505 }
 0x33c   : > { %737 = vpow2.f32 %v639_v13  ;;  %v638_v16 = vmul.f32 -1.442695, %v511_v14  ;;  %v514_v17 = vadd.f32 %v674_v8, %v506_v15 }
 0x33d   : > { %v504_v18 = vpop.permute.xlu0 %503 }
 0x33e   : > { %739 = vpow2.f32 %v638_v16  ;;  %v641_v19 = vmul.f32 -1.442695, %v514_v17  ;;  %v513_v20 = vadd.f32 %v504_v18, %v486_v9 }
 0x340   : > { %741 = vpow2.f32 %v641_v19  ;;  %v640_v21 = vmul.f32 -1.442695, %v513_v20 }
 0x342   : > { %743 = vpow2.f32 %v640_v21 }
 0x349   : > { %v738_v22 = vpop.eup %737 }
 0x34a   : > { %v528_v23 = vadd.f32 1.0, %v738_v22 }
 0x34b   : > { %v740_v24 = vpop.eup %739 }
 0x34c   : > { %745 = vrcp.f32 %v528_v23  ;;  %v527_v25 = vadd.f32 1.0, %v740_v24 }
 0x34d   : > { %v742_v26 = vpop.eup %741 }
 0x34e   : > { %747 = vrcp.f32 %v527_v25  ;;  %v530_v27 = vadd.f32 1.0, %v742_v26 }
 0x34f   : > { %v744_v28 = vpop.eup %743 }
 0x350   : > { %749 = vrcp.f32 %v530_v27  ;;  %v529_v29 = vadd.f32 1.0, %v744_v28 }
 0x352   : > { %751 = vrcp.f32 %v529_v29 }
 0x359   : > { %v746_v30 = vpop.eup %745 }
 0x35a   : > { %540 = vst.msk [vmem:[%s207_s18 + $0x8] sm:$0xff] %vm212_vm0, %v746_v30 }
 0x35b   : > { %v748_v31 = vpop.eup %747 }
 0x35c   : > { %539 = vst.msk [vmem:[%s207_s18] sm:$0xff] %vm212_vm0, %v748_v31 }
 0x35d   : > { %v750_v32 = vpop.eup %749 }
 0x35e   : > { %542 = vst.msk [vmem:[%s207_s18 + $0x18] sm:$0xff] %vm212_vm0, %v750_v32 }
 0x35f   : > { %v752_v33 = vpop.eup %751 }
 0x360   : > { %541 = vst.msk [vmem:[%s207_s18 + $0x10] sm:$0xff] %vm212_vm0, %v752_v33 }
 0x361 PF: > { %s16_s17 = sadd.s32 1, %s831_s17   ;;  %s1012_s12 = smov %s815_s13 }
 0x362   : > { %p13_p8 = scmp.ge.s32.totalorder %s16_s17, 4   ;;  %s1013_s13 = smov %s819_s14 }
 0x363   : > { %s1014_s14 = smov %s910_s24  ;;  %s1015_s15 = smov %s827_s16 }
 0x364   : > { %s1016_s16 = smov %s1018_s19  ;;  %15 = sbr.rel (!%p13_p8) target bundleno = 4 (0x4), region = 80 }
 0x369   :  { %564 = vsyncpa [#allocation5], 1 }
 0x36a   :  { %566 = vsyncpa [#allocation5 + $0x1], 1 }

</bundles_post_ra>
